<compile_context>
chip_gen: v5e
topology: v5e:2x2
jax: 0.10.0
libtpu: 0.0.40
codegen_flags: <defaults>
</compile_context>

<pallas_src>
import jax
import jax.numpy as jnp
from jax.experimental import pallas as pl
from jax.experimental.pallas import tpu as pltpu


def _round_up(v, m):
    return ((v + m - 1) // m) * m


def _vmem_limit_bytes():
    # ~96 MiB on v5e/v6e (128 MiB physical), ~48 MiB on v7x (64 MiB physical).
    try:
        cap = pltpu.get_tpu_info().vmem_capacity_bytes
    except Exception:
        cap = 64 * 1024 * 1024  # conservative fallback valid on every chip
    return min(int(cap * 3 // 4), 100 * 1024 * 1024)


def _mlp_kernel(x_ref, w1_ref, b1_ref, w2_ref, b2_ref, out_ref):
    # Cast the streamed f32 activation tile to bf16 in-kernel (VPU) so the
    # wrapper never runs a separate pad/cast prepass over x in HBM.
    x = x_ref[...].astype(jnp.bfloat16)
    # Layer 1: bf16 MXU matmul, f32 accumulation; bias + ReLU on the VPU.
    h = jnp.dot(x, w1_ref[...], preferred_element_type=jnp.float32)
    h = jnp.maximum(h + b1_ref[...], 0.0)
    # Layer 2: back to bf16 for the MXU, f32 accumulation, fused bias epilogue.
    # TODO(synk): for very large H, chunk over h_p (layer-1 N-tile doubling as
    # layer-2 K-tile) into a (tm, d_out_p) f32 scratch accumulator to bound the
    # live intermediate on v7x's 64 MiB VMEM.
    o = jnp.dot(h.astype(jnp.bfloat16), w2_ref[...],
                preferred_element_type=jnp.float32)
    out_ref[...] = (o + b2_ref[...]).astype(out_ref.dtype)


def prepare_params(w1, b1, w2, b2):
    """One-time weight prep: pad H/D_out to lane-dense multiples of 128 and
    cast to bf16. Hoisted out of the per-call path so the f32 weight read +
    bf16 rewrite is not repeated (and re-read from HBM) on every forward.

    w1: (D_in, H), b1: (H,) or (1, H), w2: (H, D_out), b2: (D_out,) or (1, D_out)
    """
    D_in, H = w1.shape
    D_out = w2.shape[1]
    h_p = _round_up(H, 128)
    d_out_p = _round_up(D_out, 128)
    w1p = jnp.pad(w1, ((0, 0), (0, h_p - H))).astype(jnp.bfloat16)
    b1p = jnp.pad(jnp.reshape(b1, (1, H)),
                  ((0, 0), (0, h_p - H))).astype(jnp.float32)
    w2p = jnp.pad(w2, ((0, h_p - H), (0, d_out_p - D_out))).astype(jnp.bfloat16)
    b2p = jnp.pad(jnp.reshape(b2, (1, D_out)),
                  ((0, 0), (0, d_out_p - D_out))).astype(jnp.float32)
    return (w1p, b1p, w2p, b2p)


def mlp_forward(x, params, output_dim, *, block_m=256):
    """Fused 2-layer MLP forward: relu(x @ w1 + b1) @ w2 + b2.

    x      : (B, D_in) float32 -- streamed per batch tile, cast bf16 in-kernel.
    params : (w1p, b1p, w2p, b2p) from prepare_params (bf16 weights, f32
             biases, padded along H / D_out); held VMEM-resident.
    returns (B, output_dim) float32.
    """
    w1p, b1p, w2p, b2p = params
    B, D_in = x.shape
    assert w1p.shape[0] == D_in
    h_p = w1p.shape[1]
    d_out_p = w2p.shape[1]

    # Batch tile (f32 sublane pack = 8). Ensure >= 2 grid steps when the batch
    # allows it so the "parallel" axis can split across v7x's 2 TensorCores.
    tm = min(block_m, _round_up(B, 8))
    if pl.cdiv(B, tm) < 2 and B > 8:
        tm = _round_up(pl.cdiv(B, 2), 8)
    grid_m = pl.cdiv(B, tm)

    flops = 2 * B * (D_in * h_p + h_p * d_out_p)
    bytes_accessed = (x.size * x.dtype.itemsize
                      + w1p.size * 2 + w2p.size * 2
                      + b1p.size * 4 + b2p.size * 4
                      + B * d_out_p * 4)

    # NOTE: resident bf16 weights cost 2*(D_in*h_p + h_p*d_out_p) bytes of
    # VMEM (single-buffered). If that approaches ~40% of VMEM (mainly on
    # v7x's 64 MiB), switch to a K-tiled variant streaming weight chunks over
    # an extra "arbitrary" grid axis with a (tm, d_out_p) f32 scratch.
    # TODO(synk): implement the K-tiled streaming-weights fallback for large H/D_in.

    def run(single_buffer_weights):
        wkw = ({"pipeline_mode": pl.Buffered(1)}
               if single_buffer_weights else {})
        grid_spec = pl.GridSpec(
            grid=(grid_m,),
            in_specs=[
                # Activation tile: streamed + double-buffered per grid step.
                pl.BlockSpec((tm, D_in), lambda i: (i, 0)),
                # Weights / biases: constant index_map -> VMEM-resident;
                # single-buffered so they don't pay 2x VMEM.
                pl.BlockSpec((D_in, h_p), lambda i: (0, 0), **wkw),
                pl.BlockSpec((1, h_p), lambda i: (0, 0), **wkw),
                pl.BlockSpec((h_p, d_out_p), lambda i: (0, 0), **wkw),
                pl.BlockSpec((1, d_out_p), lambda i: (0, 0), **wkw),
            ],
            out_specs=pl.BlockSpec((tm, d_out_p), lambda i: (i, 0)),
        )
        return pl.pallas_call(
            _mlp_kernel,
            out_shape=jax.ShapeDtypeStruct((B, d_out_p), jnp.float32),
            grid_spec=grid_spec,
            compiler_params=pltpu.CompilerParams(
                # Batch tiles are independent -> shard across TCs on v7x.
                dimension_semantics=("parallel",),
                vmem_limit_bytes=_vmem_limit_bytes(),
            ),
            cost_estimate=pl.CostEstimate(
                flops=flops, transcendentals=0, bytes_accessed=bytes_accessed),
        )(x, w1p, b1p, w2p, b2p)

    try:
        out_p = run(True)
    except Exception:
        # pipeline_mode single-buffering unsupported on this jax build; fall
        # back to default double-buffered weights (correctness unaffected).
        out_p = run(False)

    # Lane-dense padded output columns (zero weights/bias) are sliced off here.
    return out_p[:, :output_dim]


if __name__ == "__main__":
    # Small shapes consistent with MLP_1(input_dim, hidden_dim, output_dim).
    batch = 8
    input_dim = 32
    hidden_dim = 64
    output_dim = 16

    key = jax.random.PRNGKey(0)
    kx, kw1, kb1, kw2, kb2 = jax.random.split(key, 5)

    x = jax.random.normal(kx, (batch, input_dim), dtype=jnp.float32)
    # PyTorch Linear stores weight as (out, in); we keep the pre-transposed
    # (in, out) layout so the kernel computes plain x @ W + b.
    w1 = jax.random.normal(kw1, (input_dim, hidden_dim), dtype=jnp.float32) * 0.1
    b1 = jax.random.normal(kb1, (hidden_dim,), dtype=jnp.float32) * 0.1
    w2 = jax.random.normal(kw2, (hidden_dim, output_dim), dtype=jnp.float32) * 0.1
    b2 = jax.random.normal(kb2, (output_dim,), dtype=jnp.float32) * 0.1

    params = prepare_params(w1, b1, w2, b2)   # one-time pad + bf16 cast
    out = mlp_forward(x, params, output_dim)
    out = jax.block_until_ready(out)
    assert out.shape == (batch, output_dim)

    # Reference with the same bf16-operand / f32-accumulate math as the kernel.
    xb, w1b, w2b = (a.astype(jnp.bfloat16) for a in (x, w1, w2))
    h_ref = jnp.maximum(
        jnp.dot(xb, w1b, preferred_element_type=jnp.float32) + b1[None, :], 0.0)
    ref = jnp.dot(h_ref.astype(jnp.bfloat16), w2b,
                  preferred_element_type=jnp.float32) + b2[None, :]
    assert jnp.allclose(out, ref, atol=1e-2, rtol=1e-2), "mismatch vs bf16 reference"

    # Loose sanity check against the full-f32 math of the PyTorch module.
    ref_f32 = jnp.maximum(x @ w1 + b1[None, :], 0.0) @ w2 + b2[None, :]
    assert jnp.allclose(out, ref_f32, atol=5e-2, rtol=5e-2), "mismatch vs f32 reference"

    print("KERNEL_OK")
</pallas_src>

<mosaic_0001>
module attributes {stable_mosaic.version = 11 : i64} {
  func.func @_mlp_kernel(%arg0: i32, %arg1: memref<8x32xf32, #tpu.memory_space<vmem>>, %arg2: memref<32x128xbf16, #tpu.memory_space<vmem>>, %arg3: memref<1x128xf32, #tpu.memory_space<vmem>>, %arg4: memref<128x128xbf16, #tpu.memory_space<vmem>>, %arg5: memref<1x128xf32, #tpu.memory_space<vmem>>, %arg6: memref<8x128xf32, #tpu.memory_space<vmem>>) attributes {dimension_semantics = [#tpu.dimension_semantics<parallel>], iteration_bounds = array<i64: 1>, scalar_prefetch = 0 : i64, scratch_operands = 0 : i64, tpu.core_type = #tpu.core_type<tc>, window_params = [{transform_indices = @transform_0, window_bounds = array<i64: 8, 32>}, {pipeline_mode = #tpu.pipeline_mode<synchronous>, transform_indices = @transform_1, window_bounds = array<i64: 32, 128>}, {pipeline_mode = #tpu.pipeline_mode<synchronous>, transform_indices = @transform_2, window_bounds = array<i64: 1, 128>}, {pipeline_mode = #tpu.pipeline_mode<synchronous>, transform_indices = @transform_3, window_bounds = array<i64: 128, 128>}, {pipeline_mode = #tpu.pipeline_mode<synchronous>, transform_indices = @transform_4, window_bounds = array<i64: 1, 128>}, {transform_indices = @transform_5, window_bounds = array<i64: 8, 128>}]} {
    %c0 = arith.constant 0 : index
    %c0_0 = arith.constant 0 : index
    %0 = vector.load %arg1[%c0, %c0_0] : memref<8x32xf32, #tpu.memory_space<vmem>>, vector<8x32xf32>
    %1 = arith.truncf %0 : vector<8x32xf32> to vector<8x32xbf16>
    %c0_1 = arith.constant 0 : index
    %c0_2 = arith.constant 0 : index
    %2 = vector.load %arg2[%c0_1, %c0_2] : memref<32x128xbf16, #tpu.memory_space<vmem>>, vector<32x128xbf16>
    %cst = arith.constant dense<0.000000e+00> : vector<8x128xf32>
    %3 = tpu.matmul %1, %2, %cst {dimension_numbers = #tpu.dot_dimension_numbers<[1], [0], [0], [1], [0, 0, 1, 1], [], []>} : vector<8x32xbf16>, vector<32x128xbf16>, vector<8x128xf32> -> vector<8x128xf32>
    %c0_3 = arith.constant 0 : index
    %c0_4 = arith.constant 0 : index
    %4 = vector.load %arg3[%c0_3, %c0_4] : memref<1x128xf32, #tpu.memory_space<vmem>>, vector<1x128xf32>
    %5 = vector.broadcast %4 : vector<1x128xf32> to vector<8x128xf32>
    %6 = arith.addf %3, %5 : vector<8x128xf32>
    %cst_5 = arith.constant 0.000000e+00 : f32
    %7 = vector.broadcast %cst_5 : f32 to vector<8x128xf32>
    %8 = arith.maximumf %6, %7 : vector<8x128xf32>
    %9 = arith.truncf %8 : vector<8x128xf32> to vector<8x128xbf16>
    %c0_6 = arith.constant 0 : index
    %c0_7 = arith.constant 0 : index
    %10 = vector.load %arg4[%c0_6, %c0_7] : memref<128x128xbf16, #tpu.memory_space<vmem>>, vector<128x128xbf16>
    %cst_8 = arith.constant dense<0.000000e+00> : vector<8x128xf32>
    %11 = tpu.matmul %9, %10, %cst_8 {dimension_numbers = #tpu.dot_dimension_numbers<[1], [0], [0], [1], [0, 0, 1, 1], [], []>} : vector<8x128xbf16>, vector<128x128xbf16>, vector<8x128xf32> -> vector<8x128xf32>
    %c0_9 = arith.constant 0 : index
    %c0_10 = arith.constant 0 : index
    %12 = vector.load %arg5[%c0_9, %c0_10] : memref<1x128xf32, #tpu.memory_space<vmem>>, vector<1x128xf32>
    %13 = vector.broadcast %12 : vector<1x128xf32> to vector<8x128xf32>
    %14 = arith.addf %11, %13 : vector<8x128xf32>
    %c0_11 = arith.constant 0 : index
    %c0_12 = arith.constant 0 : index
    %15 = vector.load %arg6[%c0_11, %c0_12] : memref<8x128xf32, #tpu.memory_space<vmem>>, vector<8x128xf32>
    tpu.vector_store %arg6[%c0_11, %c0_12], %14 {strides = array<i32>} : memref<8x128xf32, #tpu.memory_space<vmem>>, vector<8x128xf32>,
    return
  }
  func.func @transform_0(%arg0: i32) -> (i32, i32) {
    %c0_i32 = arith.constant 0 : i32
    %c0_i32_0 = arith.constant 0 : i32
    return %arg0, %c0_i32 : i32, i32
  }
  func.func @transform_1(%arg0: i32) -> (i32, i32) {
    %c0_i32 = arith.constant 0 : i32
    %c0_i32_0 = arith.constant 0 : i32
    %c0_i32_1 = arith.constant 0 : i32
    return %c0_i32, %c0_i32_0 : i32, i32
  }
  func.func @transform_2(%arg0: i32) -> (i32, i32) {
    %c0_i32 = arith.constant 0 : i32
    %c0_i32_0 = arith.constant 0 : i32
    %c0_i32_1 = arith.constant 0 : i32
    return %c0_i32, %c0_i32_0 : i32, i32
  }
  func.func @transform_3(%arg0: i32) -> (i32, i32) {
    %c0_i32 = arith.constant 0 : i32
    %c0_i32_0 = arith.constant 0 : i32
    %c0_i32_1 = arith.constant 0 : i32
    return %c0_i32, %c0_i32_0 : i32, i32
  }
  func.func @transform_4(%arg0: i32) -> (i32, i32) {
    %c0_i32 = arith.constant 0 : i32
    %c0_i32_0 = arith.constant 0 : i32
    %c0_i32_1 = arith.constant 0 : i32
    return %c0_i32, %c0_i32_0 : i32, i32
  }
  func.func @transform_5(%arg0: i32) -> (i32, i32) {
    %c0_i32 = arith.constant 0 : i32
    %c0_i32_0 = arith.constant 0 : i32
    return %arg0, %c0_i32 : i32, i32
  }
}

module attributes {stable_mosaic.version = 11 : i64} {
  func.func @_mlp_kernel(%arg0: i32, %arg1: memref<8x32xf32, #tpu.memory_space<vmem>>, %arg2: memref<32x128xbf16, #tpu.memory_space<vmem>>, %arg3: memref<1x128xf32, #tpu.memory_space<vmem>>, %arg4: memref<128x128xbf16, #tpu.memory_space<vmem>>, %arg5: memref<1x128xf32, #tpu.memory_space<vmem>>, %arg6: memref<8x128xf32, #tpu.memory_space<vmem>>) attributes {dimension_semantics = [#tpu.dimension_semantics<parallel>], iteration_bounds = array<i64: 1>, scalar_prefetch = 0 : i64, scratch_operands = 0 : i64, tpu.core_type = #tpu.core_type<tc>, window_params = [{transform_indices = @transform_0, window_bounds = array<i64: 8, 32>}, {pipeline_mode = #tpu.pipeline_mode<synchronous>, transform_indices = @transform_1, window_bounds = array<i64: 32, 128>}, {pipeline_mode = #tpu.pipeline_mode<synchronous>, transform_indices = @transform_2, window_bounds = array<i64: 1, 128>}, {pipeline_mode = #tpu.pipeline_mode<synchronous>, transform_indices = @transform_3, window_bounds = array<i64: 128, 128>}, {pipeline_mode = #tpu.pipeline_mode<synchronous>, transform_indices = @transform_4, window_bounds = array<i64: 1, 128>}, {transform_indices = @transform_5, window_bounds = array<i64: 8, 128>}]} {
    %c0 = arith.constant 0 : index
    %c0_0 = arith.constant 0 : index
    %0 = vector.load %arg1[%c0, %c0_0] : memref<8x32xf32, #tpu.memory_space<vmem>>, vector<8x32xf32>
    %1 = arith.truncf %0 : vector<8x32xf32> to vector<8x32xbf16>
    %c0_1 = arith.constant 0 : index
    %c0_2 = arith.constant 0 : index
    %2 = vector.load %arg2[%c0_1, %c0_2] : memref<32x128xbf16, #tpu.memory_space<vmem>>, vector<32x128xbf16>
    %cst = arith.constant dense<0.000000e+00> : vector<8x128xf32>
    %3 = tpu.matmul %1, %2, %cst {dimension_numbers = #tpu.dot_dimension_numbers<[1], [0], [0], [1], [0, 0, 1, 1], [], []>} : vector<8x32xbf16>, vector<32x128xbf16>, vector<8x128xf32> -> vector<8x128xf32>
    %c0_3 = arith.constant 0 : index
    %c0_4 = arith.constant 0 : index
    %4 = vector.load %arg3[%c0_3, %c0_4] : memref<1x128xf32, #tpu.memory_space<vmem>>, vector<1x128xf32>
    %5 = vector.broadcast %4 : vector<1x128xf32> to vector<8x128xf32>
    %6 = arith.addf %3, %5 : vector<8x128xf32>
    %cst_5 = arith.constant 0.000000e+00 : f32
    %7 = vector.broadcast %cst_5 : f32 to vector<8x128xf32>
    %8 = arith.maximumf %6, %7 : vector<8x128xf32>
    %9 = arith.truncf %8 : vector<8x128xf32> to vector<8x128xbf16>
    %c0_6 = arith.constant 0 : index
    %c0_7 = arith.constant 0 : index
    %10 = vector.load %arg4[%c0_6, %c0_7] : memref<128x128xbf16, #tpu.memory_space<vmem>>, vector<128x128xbf16>
    %cst_8 = arith.constant dense<0.000000e+00> : vector<8x128xf32>
    %11 = tpu.matmul %9, %10, %cst_8 {dimension_numbers = #tpu.dot_dimension_numbers<[1], [0], [0], [1], [0, 0, 1, 1], [], []>} : vector<8x128xbf16>, vector<128x128xbf16>, vector<8x128xf32> -> vector<8x128xf32>
    %c0_9 = arith.constant 0 : index
    %c0_10 = arith.constant 0 : index
    %12 = vector.load %arg5[%c0_9, %c0_10] : memref<1x128xf32, #tpu.memory_space<vmem>>, vector<1x128xf32>
    %13 = vector.broadcast %12 : vector<1x128xf32> to vector<8x128xf32>
    %14 = arith.addf %11, %13 : vector<8x128xf32>
    %c0_11 = arith.constant 0 : index
    %c0_12 = arith.constant 0 : index
    %15 = vector.load %arg6[%c0_11, %c0_12] : memref<8x128xf32, #tpu.memory_space<vmem>>, vector<8x128xf32>
    tpu.vector_store %arg6[%c0_11, %c0_12], %14 {strides = array<i32>} : memref<8x128xf32, #tpu.memory_space<vmem>>, vector<8x128xf32>,
    return
  }
  func.func @transform_0(%arg0: i32) -> (i32, i32) {
    %c0_i32 = arith.constant 0 : i32
    %c0_i32_0 = arith.constant 0 : i32
    return %arg0, %c0_i32 : i32, i32
  }
  func.func @transform_1(%arg0: i32) -> (i32, i32) {
    %c0_i32 = arith.constant 0 : i32
    %c0_i32_0 = arith.constant 0 : i32
    %c0_i32_1 = arith.constant 0 : i32
    return %c0_i32, %c0_i32_0 : i32, i32
  }
  func.func @transform_2(%arg0: i32) -> (i32, i32) {
    %c0_i32 = arith.constant 0 : i32
    %c0_i32_0 = arith.constant 0 : i32
    %c0_i32_1 = arith.constant 0 : i32
    return %c0_i32, %c0_i32_0 : i32, i32
  }
  func.func @transform_3(%arg0: i32) -> (i32, i32) {
    %c0_i32 = arith.constant 0 : i32
    %c0_i32_0 = arith.constant 0 : i32
    %c0_i32_1 = arith.constant 0 : i32
    return %c0_i32, %c0_i32_0 : i32, i32
  }
  func.func @transform_4(%arg0: i32) -> (i32, i32) {
    %c0_i32 = arith.constant 0 : i32
    %c0_i32_0 = arith.constant 0 : i32
    %c0_i32_1 = arith.constant 0 : i32
    return %c0_i32, %c0_i32_0 : i32, i32
  }
  func.func @transform_5(%arg0: i32) -> (i32, i32) {
    %c0_i32 = arith.constant 0 : i32
    %c0_i32_0 = arith.constant 0 : i32
    return %arg0, %c0_i32 : i32, i32
  }
}

</mosaic_0001>

<bundles_post_ra>
// kernel: tpu_custom_call.1
= control target key start
LH: loop header
LB: loop body
LE: loop exit
PB: predicated region body
PF: predicated region fallthrough
CT: control target
= control target key end

     0   :  { %10 = vsyncpa [#allocation3], 0  ;;  %s423_s0 = inlined_call_operand.hbm [shape: f32[8,32], index: 0, kind: input, shape index: {}]   ;;  %s424_s1 = inlined_call_operand.hbm [shape: bf16[32,128], index: 1, kind: input, shape index: {}]   ;;  %s425_s2 = inlined_call_operand.vmem [shape: f32[1,128], index: 2, kind: input, shape index: {}]   ;;  %s426_s3 = inlined_call_operand.hbm [shape: bf16[128,128], index: 3, kind: input, shape index: {}]   ;;  %s427_s4 = inlined_call_operand.vmem [shape: f32[1,128], index: 4, kind: input, shape index: {}]   ;;  %s428_s5 = inlined_call_operand.hbm [shape: f32[8,128], index: 5, kind: output, shape index: {}]  }
   0x1   :  { %11 = vsyncpa [#allocation6], 0  ;;  %s28_s20 = sshll.u32 %s424_s1, 4  ;;  %s29_s20 = int_to_ptr.hbm [resolvable:$true] %s28_s20 }
   0x2   :  { %12 = vsyncpa [#allocation4], 0  ;;  %s369_s21 = smov [#allocation5]   ;;  %s18_s25 = sshll.u32 %s423_s0, 4  ;;  %s19_s25 = int_to_ptr.hbm [resolvable:$true] %s18_s25 }
   0x3   :  { %s30_s22 = sshll.u32 %s369_s21, 4  ;;  %s370_s26 = smov 64   ;;  %s31_s22 = int_to_ptr.vmem [resolvable:$true] %s30_s22 }
   0x4   :  { %s371_s27 = smov 4   ;;  %s372_s28 = smov [#allocation2]  }
   0x5   :  { %36 = dma.hbm_to_vmem [thread:$0]  %s29_s20, 256, %s31_s22, [#allocation6], %s370_s26, %s370_s26, %s371_s27  }
   0x6   :  { %s20_s29 = sshll.u32 %s372_s28, 4  ;;  %s43_s7 = sshll.u32 %s426_s3, 4  ;;  %s21_s29 = int_to_ptr.vmem [resolvable:$true] %s20_s29  ;;  %s44_s7 = int_to_ptr.hbm [resolvable:$true] %s43_s7 }
   0x7   :  { %23 = dma.hbm_to_vmem [thread:$0]  %s19_s25, 128, %s21_s29, [#allocation3]  }
   0x8   :  { %s373_s1 = smov [#allocation7]  }
   0x9   :  { %s45_s8 = sshll.u32 %s373_s1, 4  ;;  %s46_s8 = int_to_ptr.vmem [resolvable:$true] %s45_s8 }
   0xa   :  { %51 = dma.hbm_to_vmem [thread:$0]  %s44_s7, 1024, %s46_s8, [#allocation6], %s370_s26, %s370_s26, %s371_s27  }
   0xb   :  { %363 = dma.done.wait [#allocation3], 128  }
   0xc   :  { %364 = vsyncadd [#allocation3], 4294967168 }
   0xd   :  { %365 = dma.done.wait [#allocation6], 1280  }
   0xe   :  { %366 = vsyncadd [#allocation6], 4294966016  ;;  %v250_v0 = vld [vmem:[#allocation5 + $0x8] sm:$0xff]  ;;  %v249_v2 = vld [vmem:[#allocation5] sm:$0xff]  ;;  %vm89_vm0 = vcmask 261120   ;;  %s374_s11 = smov [#allocation8]  }
   0xf   :  { %v258_v1 = vld [vmem:[#allocation7 + $0x38] sm:$0xff]  ;;  %99 = vmatpush.bf16.msra.mxu0 %v250_v0  ;;  %v67_v3 = vld [vmem:[#allocation2] sm:$0xff]  ;;  %v257_v4 = vld [vmem:[#allocation7 + $0x30] sm:$0xff]  ;;  %s195_s12 = sshll.u32 %s374_s11, 4  ;;  %s197_s15 = sshll.u32 %s428_s5, 4  ;;  %s196_s12 = int_to_ptr.vmem [resolvable:$true] %s195_s12  ;;  %s198_s15 = int_to_ptr.hbm [resolvable:$true] %s197_s15 }
  0x10   :  { %176 = vmatpush.bf16.msra.mxu1 %v258_v1  ;;  %v68_v5 = vpack.c.bf16 %v67_v3, %v67_v3  ;;  %v256_v6 = vld [vmem:[#allocation7 + $0x28] sm:$0xff]  ;;  %v255_v7 = vld [vmem:[#allocation7 + $0x20] sm:$0xff]  ;;  %v254_v8 = vld [vmem:[#allocation7 + $0x18] sm:$0xff] }
  0x11   :  { %v253_v9 = vld [vmem:[#allocation7 + $0x10] sm:$0xff]  ;;  %v252_v10 = vld [vmem:[#allocation7 + $0x8] sm:$0xff]  ;;  %v251_v11 = vld [vmem:[#allocation7] sm:$0xff] }
  0x12   :  { %v265_v12 = vld [vmem:[%s425_s2] ss:$0 sm:$0xff] }
  0x13   :  { %100 = vmatpush.bf16.msra.mxu0 %v249_v2  ;;  %v266_v18 = vld [vmem:[%s427_s4] ss:$0 sm:$0xff] }
  0x14   :  { %177 = vmatpush.bf16.msra.mxu1 %v257_v4 }
  0x16   :  { %216 = vmatmul.msk.bf16.vlgmr.msra.gmra.mxu0 %vm89_vm0, %v68_v5 }
  0x18   :  { %178 = vmatpush.bf16.msra.mxu1 %v256_v6 }
  0x1c   :  { %179 = vmatpush.bf16.msra.mxu1 %v255_v7 }
  0x20   :  { %180 = vmatpush.bf16.msra.mxu1 %v254_v8 }
  0x24   :  { %181 = vmatpush.bf16.msra.mxu1 %v253_v9 }
  0x28   :  { %182 = vmatpush.bf16.msra.mxu1 %v252_v10 }
  0x2c   :  { %183 = vmatpush.bf16.msra.mxu1 %v251_v11 }
  0x93   :  { %v102_v13 = vpop.f32.mrf.mxu0 }
  0x94   :  { %v103_v14 = vadd.f32 %v265_v12, %v102_v13 }
  0x96   :  { %v106_v15 = vmax.f32 %v103_v14, 0.0 }
  0x98   :  { %v107_v16 = vpack.c.bf16 %v106_v15, %v106_v15 }
  0x9a   :  { %184 = vmatmul.bf16.vlgmr.msra.gmra.mxu1 %v107_v16 }
  0x9b   :  { %v104_v17 = vpop.f32.mrf.mxu0 }
 0x117   :  { %v185_v19 = vpop.f32.mrf.mxu1 }
 0x118   :  { %v186_v20 = vadd.f32 %v266_v18, %v185_v19 }
 0x11a   :  { %189 = vst [vmem:[#allocation8] sm:$0xff] %v186_v20 }
 0x11b   :  { %200 = dma.vmem_to_hbm [thread:$0]  %s196_s12, 128, %s198_s15, [#allocation4]  }
 0x11f   :  { %v187_v21 = vpop.f32.mrf.mxu1 }
 0x120   :  { %367 = dma.done.wait [#allocation4], 128  }
 0x121   :  { %368 = vsyncadd [#allocation4], 4294967168 }
 0x122   :  { %205 = vsyncpa [#allocation3], 1 }
 0x123   :  { %206 = vsyncpa [#allocation6], 1 }
 0x124   :  { %207 = vsyncpa [#allocation4], 1 }

// kernel: tpu_custom_call.1
= control target key start
LH: loop header
LB: loop body
LE: loop exit
PB: predicated region body
PF: predicated region fallthrough
CT: control target
= control target key end

     0   :  { %10 = vsyncpa [#allocation3], 0  ;;  %s423_s0 = inlined_call_operand.hbm [shape: f32[8,32], index: 0, kind: input, shape index: {}]   ;;  %s424_s1 = inlined_call_operand.hbm [shape: bf16[32,128], index: 1, kind: input, shape index: {}]   ;;  %s425_s2 = inlined_call_operand.vmem [shape: f32[1,128], index: 2, kind: input, shape index: {}]   ;;  %s426_s3 = inlined_call_operand.hbm [shape: bf16[128,128], index: 3, kind: input, shape index: {}]   ;;  %s427_s4 = inlined_call_operand.vmem [shape: f32[1,128], index: 4, kind: input, shape index: {}]   ;;  %s428_s5 = inlined_call_operand.hbm [shape: f32[8,128], index: 5, kind: output, shape index: {}]  }
   0x1   :  { %11 = vsyncpa [#allocation6], 0  ;;  %s28_s20 = sshll.u32 %s424_s1, 4  ;;  %s29_s20 = int_to_ptr.hbm [resolvable:$true] %s28_s20 }
   0x2   :  { %12 = vsyncpa [#allocation4], 0  ;;  %s369_s21 = smov [#allocation5]   ;;  %s18_s25 = sshll.u32 %s423_s0, 4  ;;  %s19_s25 = int_to_ptr.hbm [resolvable:$true] %s18_s25 }
   0x3   :  { %s30_s22 = sshll.u32 %s369_s21, 4  ;;  %s370_s26 = smov 64   ;;  %s31_s22 = int_to_ptr.vmem [resolvable:$true] %s30_s22 }
   0x4   :  { %s371_s27 = smov 4   ;;  %s372_s28 = smov [#allocation2]  }
   0x5   :  { %36 = dma.hbm_to_vmem [thread:$0]  %s29_s20, 256, %s31_s22, [#allocation6], %s370_s26, %s370_s26, %s371_s27  }
   0x6   :  { %s20_s29 = sshll.u32 %s372_s28, 4  ;;  %s43_s7 = sshll.u32 %s426_s3, 4  ;;  %s21_s29 = int_to_ptr.vmem [resolvable:$true] %s20_s29  ;;  %s44_s7 = int_to_ptr.hbm [resolvable:$true] %s43_s7 }
   0x7   :  { %23 = dma.hbm_to_vmem [thread:$0]  %s19_s25, 128, %s21_s29, [#allocation3]  }
   0x8   :  { %s373_s1 = smov [#allocation7]  }
   0x9   :  { %s45_s8 = sshll.u32 %s373_s1, 4  ;;  %s46_s8 = int_to_ptr.vmem [resolvable:$true] %s45_s8 }
   0xa   :  { %51 = dma.hbm_to_vmem [thread:$0]  %s44_s7, 1024, %s46_s8, [#allocation6], %s370_s26, %s370_s26, %s371_s27  }
   0xb   :  { %363 = dma.done.wait [#allocation3], 128  }
   0xc   :  { %364 = vsyncadd [#allocation3], 4294967168 }
   0xd   :  { %365 = dma.done.wait [#allocation6], 1280  }
   0xe   :  { %366 = vsyncadd [#allocation6], 4294966016  ;;  %v250_v0 = vld [vmem:[#allocation5 + $0x8] sm:$0xff]  ;;  %v249_v2 = vld [vmem:[#allocation5] sm:$0xff]  ;;  %vm89_vm0 = vcmask 261120   ;;  %s374_s11 = smov [#allocation8]  }
   0xf   :  { %v258_v1 = vld [vmem:[#allocation7 + $0x38] sm:$0xff]  ;;  %99 = vmatpush.bf16.msra.mxu0 %v250_v0  ;;  %v67_v3 = vld [vmem:[#allocation2] sm:$0xff]  ;;  %v257_v4 = vld [vmem:[#allocation7 + $0x30] sm:$0xff]  ;;  %s195_s12 = sshll.u32 %s374_s11, 4  ;;  %s197_s15 = sshll.u32 %s428_s5, 4  ;;  %s196_s12 = int_to_ptr.vmem [resolvable:$true] %s195_s12  ;;  %s198_s15 = int_to_ptr.hbm [resolvable:$true] %s197_s15 }
  0x10   :  { %176 = vmatpush.bf16.msra.mxu1 %v258_v1  ;;  %v68_v5 = vpack.c.bf16 %v67_v3, %v67_v3  ;;  %v256_v6 = vld [vmem:[#allocation7 + $0x28] sm:$0xff]  ;;  %v255_v7 = vld [vmem:[#allocation7 + $0x20] sm:$0xff]  ;;  %v254_v8 = vld [vmem:[#allocation7 + $0x18] sm:$0xff] }
  0x11   :  { %v253_v9 = vld [vmem:[#allocation7 + $0x10] sm:$0xff]  ;;  %v252_v10 = vld [vmem:[#allocation7 + $0x8] sm:$0xff]  ;;  %v251_v11 = vld [vmem:[#allocation7] sm:$0xff] }
  0x12   :  { %v265_v12 = vld [vmem:[%s425_s2] ss:$0 sm:$0xff] }
  0x13   :  { %100 = vmatpush.bf16.msra.mxu0 %v249_v2  ;;  %v266_v18 = vld [vmem:[%s427_s4] ss:$0 sm:$0xff] }
  0x14   :  { %177 = vmatpush.bf16.msra.mxu1 %v257_v4 }
  0x16   :  { %216 = vmatmul.msk.bf16.vlgmr.msra.gmra.mxu0 %vm89_vm0, %v68_v5 }
  0x18   :  { %178 = vmatpush.bf16.msra.mxu1 %v256_v6 }
  0x1c   :  { %179 = vmatpush.bf16.msra.mxu1 %v255_v7 }
  0x20   :  { %180 = vmatpush.bf16.msra.mxu1 %v254_v8 }
  0x24   :  { %181 = vmatpush.bf16.msra.mxu1 %v253_v9 }
  0x28   :  { %182 = vmatpush.bf16.msra.mxu1 %v252_v10 }
  0x2c   :  { %183 = vmatpush.bf16.msra.mxu1 %v251_v11 }
  0x93   :  { %v102_v13 = vpop.f32.mrf.mxu0 }
  0x94   :  { %v103_v14 = vadd.f32 %v265_v12, %v102_v13 }
  0x96   :  { %v106_v15 = vmax.f32 %v103_v14, 0.0 }
  0x98   :  { %v107_v16 = vpack.c.bf16 %v106_v15, %v106_v15 }
  0x9a   :  { %184 = vmatmul.bf16.vlgmr.msra.gmra.mxu1 %v107_v16 }
  0x9b   :  { %v104_v17 = vpop.f32.mrf.mxu0 }
 0x117   :  { %v185_v19 = vpop.f32.mrf.mxu1 }
 0x118   :  { %v186_v20 = vadd.f32 %v266_v18, %v185_v19 }
 0x11a   :  { %189 = vst [vmem:[#allocation8] sm:$0xff] %v186_v20 }
 0x11b   :  { %200 = dma.vmem_to_hbm [thread:$0]  %s196_s12, 128, %s198_s15, [#allocation4]  }
 0x11f   :  { %v187_v21 = vpop.f32.mrf.mxu1 }
 0x120   :  { %367 = dma.done.wait [#allocation4], 128  }
 0x121   :  { %368 = vsyncadd [#allocation4], 4294967168 }
 0x122   :  { %205 = vsyncpa [#allocation3], 1 }
 0x123   :  { %206 = vsyncpa [#allocation6], 1 }
 0x124   :  { %207 = vsyncpa [#allocation4], 1 }

</bundles_post_ra>
